<compile_context>
chip_gen: v7x
topology: tpu7x:2x2x1
jax: 0.10.0
libtpu: 0.0.40
codegen_flags: <defaults>
</compile_context>

<pallas_src>
import numpy as np
import jax
import jax.numpy as jnp
from jax.experimental import pallas as pl
from jax.experimental.pallas import tpu as pltpu


def _make_kernel(n_cls):
    def kernel(valid_ref, labels_ref, acts_ref, id_ref, sum_ref, cnt_ref):
        b = pl.program_id(0)
        # Each grid step owns its own (1,1) output blocks -> zero them first.
        sum_ref[...] = jnp.zeros_like(sum_ref)
        cnt_ref[...] = jnp.zeros_like(cnt_ref)

        labels = labels_ref[...]          # [1, S] int32 (0-based classes, -1 == ignore)
        a = acts_ref[...]                 # [P, S] f32 prototype activations (lane-dense)

        for c in range(n_cls):            # unrolled static class loop
            @pl.when(valid_ref[b, c] > 0)     # SMEM scalar gate: skip all work if invalid
            def _(c=c):
                mask = labels == c                                               # [1, S]
                count = jnp.sum(mask.astype(jnp.float32), axis=1, keepdims=True)  # [1, 1]

                am = jnp.where(mask, a, jnp.float32(-1e30))                      # [P, S]
                m_p = jnp.max(am, axis=1, keepdims=True)                         # [P, 1]
                e = jnp.exp(am - m_p)                         # [P, S]; exact 0 off-mask
                z = jnp.sum(e, axis=1, keepdims=True)                            # [P, 1]
                t = jnp.sum(e * (am - m_p), axis=1, keepdims=True)               # [P, 1]
                ent = jnp.log(z) - t / z          # per-prototype entropy (nats)  [P, 1]

                w = id_ref[:, c:c + 1]            # 0/1 prototype membership      [P, 1]
                nproto = jnp.sum(w, axis=0, keepdims=True)                       # [1, 1]
                cls_term = jnp.sum(w * ent, axis=0, keepdims=True) / (
                    nproto * jnp.log(count))                                     # [1, 1]

                sum_ref[...] += cls_term
                cnt_ref[...] += 1.0

    return kernel


def entropy_spat_loss(prototype_activations, target_labels, prototype_class_identity):
    """Pallas equivalent of EntropySpatLoss.forward.

    prototype_activations: array reshapeable to [B, S, P] (same view as the PyTorch code).
    target_labels: [B, ...] int labels, 1-based; 0 == ignore.
    prototype_class_identity: [P, C] (nonzero == prototype belongs to class).
    Returns a float32 scalar.
    """
    proto_id = jnp.asarray(prototype_class_identity)
    P, C = proto_id.shape
    B = target_labels.shape[0]

    labels = jnp.reshape(target_labels, (B, -1)).astype(jnp.int32) - 1           # [B, S]
    acts = jnp.reshape(prototype_activations, (B, -1, P)).astype(jnp.float32)    # [B, S, P]
    S = labels.shape[1]

    # Layout plumbing in the wrapper: spatial axis onto lanes, labels lane-dense too.
    acts_t = jnp.transpose(acts, (0, 2, 1))                                      # [B, P, S]
    labels3 = labels.reshape(B, 1, S)                                            # [B, 1, S]
    proto_ind = (proto_id != 0).astype(jnp.float32)                              # [P, C]

    # Per-(image, class) validity, scalar-prefetched into SMEM.
    counts = jnp.sum(
        (labels[:, :, None] == jnp.arange(C, dtype=jnp.int32)[None, None, :]
         ).astype(jnp.int32), axis=1)                                            # [B, C]
    has_protos = jnp.sum(proto_ind, axis=0) > 0.0                                # [C]
    valid = jnp.logical_and(counts >= 2, has_protos[None, :]).astype(jnp.int32)  # [B, C]

    # TODO(synk): for very large S, tile the spatial axis with a two-pass streaming
    # logsumexp instead of a single (P, S) block (keeps the block inside v5e's 16 MiB /
    # v7x's 32 MiB scoped VMEM).
    sums, cnts = pl.pallas_call(
        _make_kernel(C),
        out_shape=(jax.ShapeDtypeStruct((B, 1, 1), jnp.float32),
                   jax.ShapeDtypeStruct((B, 1, 1), jnp.float32)),
        grid_spec=pltpu.PrefetchScalarGridSpec(
            num_scalar_prefetch=1,
            grid=(B,),                                            # one grid step per image
            in_specs=[
                pl.BlockSpec((None, 1, S), lambda b, valid: (b, 0, 0)),   # labels (image b)
                pl.BlockSpec((None, P, S), lambda b, valid: (b, 0, 0)),   # activations
                pl.BlockSpec((P, C), lambda b, valid: (0, 0)),            # prototype identity
            ],
            out_specs=[
                pl.BlockSpec((None, 1, 1), lambda b, valid: (b, 0, 0)),   # per-image sum
                pl.BlockSpec((None, 1, 1), lambda b, valid: (b, 0, 0)),   # per-image count
            ],
        ),
        compiler_params=pltpu.CompilerParams(
            dimension_semantics=("parallel",)),                   # images are independent
    )(valid, labels3, acts_t, proto_ind)

    total = jnp.sum(sums)
    n = jnp.sum(cnts)
    return jnp.where(n > 0.0, total / n, jnp.float32(0.0))        # graceful 0.0 if no entry


def entropy_spat_loss_ref(prototype_activations, target_labels, prototype_class_identity):
    """Direct NumPy port of the PyTorch EntropySpatLoss.forward (verification only)."""
    proto_id = np.asarray(prototype_class_identity)
    P, C = proto_id.shape
    tl = np.asarray(target_labels)
    labels = tl.reshape(tl.shape[0], -1).astype(np.int64) - 1
    acts = np.asarray(prototype_activations, dtype=np.float64).reshape(labels.shape[0], -1, P)
    losses = []
    for b in range(labels.shape[0]):
        for cls_i in np.unique(labels[b]):
            if cls_i < 0 or cls_i >= C:
                continue
            cls_protos = np.nonzero(proto_id[:, cls_i])[0]
            if len(cls_protos) == 0:
                continue
            m = labels[b] == cls_i
            n = int(m.sum())
            if n < 2:
                continue
            log_norm = np.log(float(n))
            ents = []
            for p in cls_protos:
                act = acts[b, m, p]
                shifted = act - act.max()
                e = np.exp(shifted)
                z = e.sum()
                prob = e / z
                logp = shifted - np.log(z)
                ents.append(np.sum(-prob * logp) / log_norm)
            losses.append(float(np.mean(ents)))
    if not losses:
        return 0.0
    return float(np.mean(losses))


if __name__ == "__main__":
    key = jax.random.PRNGKey(0)
    B, C, H, W = 2, 4, 16, 16
    protos_per_class = 3
    P = C * protos_per_class
    k1, k2 = jax.random.split(key)

    # [P, C] prototype->class identity: 3 prototypes per class.
    prototype_class_identity = jnp.repeat(jnp.eye(C, dtype=jnp.float32),
                                          protos_per_class, axis=0)
    # Labels in {0,...,C}; 0 == ignore (the module subtracts 1).
    target_labels = jax.random.randint(k1, (B, H, W), 0, C + 1, dtype=jnp.int32)
    # Prototype activations per spatial position (the module views them as [B, S, P]).
    prototype_activations = jax.random.normal(k2, (B, H, W, P), jnp.float32) * 2.0

    loss = jax.block_until_ready(
        entropy_spat_loss(prototype_activations, target_labels, prototype_class_identity))

    ref = entropy_spat_loss_ref(np.asarray(prototype_activations),
                                np.asarray(target_labels),
                                np.asarray(prototype_class_identity))
    assert abs(float(loss) - ref) <= 1e-3 * max(1.0, abs(ref)), (float(loss), ref)
    print("KERNEL_OK")
</pallas_src>

<mosaic_0001>
module attributes {stable_mosaic.version = 11 : i64} {
  func.func @kernel(%arg0: i32, %arg1: memref<2x4xi32, #tpu.memory_space<smem>>, %arg2: memref<1x1x256xi32, #tpu.memory_space<vmem>>, %arg3: memref<1x12x256xf32, #tpu.memory_space<vmem>>, %arg4: memref<12x4xf32, #tpu.memory_space<vmem>>, %arg5: memref<1x1x1xf32, #tpu.memory_space<vmem>>, %arg6: memref<1x1x1xf32, #tpu.memory_space<vmem>>) attributes {dimension_semantics = [#tpu.dimension_semantics<parallel>], iteration_bounds = array<i64: 2>, scalar_prefetch = 1 : i64, scratch_operands = 0 : i64, tpu.core_type = #tpu.core_type<tc>, window_params = [{transform_indices = @transform_0, window_bounds = array<i64: 1, 1, 256>}, {transform_indices = @transform_1, window_bounds = array<i64: 1, 12, 256>}, {pipeline_mode = #tpu.pipeline_mode<synchronous>, transform_indices = @transform_2, window_bounds = array<i64: 12, 4>}, {transform_indices = @transform_3, window_bounds = array<i64: 1, 1, 1>}, {transform_indices = @transform_4, window_bounds = array<i64: 1, 1, 1>}]} {
    %cst = arith.constant 0.000000e+00 : f32
    %0 = vector.broadcast %cst : f32 to vector<1x1xf32>
    %c0 = arith.constant 0 : index
    %c0_0 = arith.constant 0 : index
    %c0_1 = arith.constant 0 : index
    %1 = vector.load %arg5[%c0, %c0_0, %c0_1] : memref<1x1x1xf32, #tpu.memory_space<vmem>>, vector<1x1x1xf32>
    %2 = vector.shape_cast %1 : vector<1x1x1xf32> to vector<1x1xf32>
    %3 = vector.shape_cast %0 : vector<1x1xf32> to vector<1x1x1xf32>
    tpu.vector_store %arg5[%c0, %c0_0, %c0_1], %3 {strides = array<i32>} : memref<1x1x1xf32, #tpu.memory_space<vmem>>, vector<1x1x1xf32>,
    %cst_2 = arith.constant 0.000000e+00 : f32
    %4 = vector.broadcast %cst_2 : f32 to vector<1x1xf32>
    %c0_3 = arith.constant 0 : index
    %c0_4 = arith.constant 0 : index
    %c0_5 = arith.constant 0 : index
    %5 = vector.load %arg6[%c0_3, %c0_4, %c0_5] : memref<1x1x1xf32, #tpu.memory_space<vmem>>, vector<1x1x1xf32>
    %6 = vector.shape_cast %5 : vector<1x1x1xf32> to vector<1x1xf32>
    %7 = vector.shape_cast %4 : vector<1x1xf32> to vector<1x1x1xf32>
    tpu.vector_store %arg6[%c0_3, %c0_4, %c0_5], %7 {strides = array<i32>} : memref<1x1x1xf32, #tpu.memory_space<vmem>>, vector<1x1x1xf32>,
    %c0_6 = arith.constant 0 : index
    %c0_7 = arith.constant 0 : index
    %c0_8 = arith.constant 0 : index
    %8 = vector.load %arg2[%c0_6, %c0_7, %c0_8] : memref<1x1x256xi32, #tpu.memory_space<vmem>>, vector<1x1x256xi32>
    %9 = vector.shape_cast %8 : vector<1x1x256xi32> to vector<1x256xi32>
    %c0_9 = arith.constant 0 : index
    %c0_10 = arith.constant 0 : index
    %c0_11 = arith.constant 0 : index
    %10 = vector.load %arg3[%c0_9, %c0_10, %c0_11] : memref<1x12x256xf32, #tpu.memory_space<vmem>>, vector<1x12x256xf32>
    %11 = vector.shape_cast %10 : vector<1x12x256xf32> to vector<12x256xf32>
    %12 = arith.index_cast %arg0 : i32 to index
    %c0_12 = arith.constant 0 : index
    %13 = memref.load %arg1[%12, %c0_12] : memref<2x4xi32, #tpu.memory_space<smem>>
    %c0_i32 = arith.constant 0 : i32
    %14 = arith.cmpi sgt, %13, %c0_i32 : i32
    %15 = arith.extui %14 : i1 to i32
    %c0_i32_13 = arith.constant 0 : i32
    %16 = arith.cmpi ne, %15, %c0_i32_13 : i32
    scf.if %16 {
      %c0_i32_20 = arith.constant 0 : i32
      %32 = vector.broadcast %c0_i32_20 : i32 to vector<1x256xi32>
      %33 = arith.cmpi eq, %9, %32 : vector<1x256xi32>
      %34 = arith.extui %33 : vector<1x256xi1> to vector<1x256xi32>
      %35 = arith.sitofp %34 : vector<1x256xi32> to vector<1x256xf32>
      %cst_21 = arith.constant dense<0.000000e+00> : vector<1xf32>
      %36 = vector.multi_reduction <add>, %35, %cst_21 [1] : vector<1x256xf32> to vector<1xf32>
      %37 = vector.shape_cast %36 : vector<1xf32> to vector<1x1xf32>
      %cst_22 = arith.constant -1.000000e+30 : f32
      %38 = vector.shape_cast %33 : vector<1x256xi1> to vector<1x256xi1>
      %39 = vector.broadcast %38 : vector<1x256xi1> to vector<12x256xi1>
      %40 = vector.broadcast %cst_22 : f32 to vector<12x256xf32>
      %41 = arith.select %39, %11, %40 : vector<12x256xi1>, vector<12x256xf32>
      %cst_23 = arith.constant dense<0xFF800000> : vector<12xf32>
      %42 = vector.multi_reduction <maximumf>, %41, %cst_23 [1] : vector<12x256xf32> to vector<12xf32>
      %43 = vector.shape_cast %42 : vector<12xf32> to vector<12x1xf32>
      %44 = vector.broadcast %43 : vector<12x1xf32> to vector<12x256xf32>
      %45 = arith.subf %41, %44 : vector<12x256xf32>
      %46 = math.exp %45 : vector<12x256xf32>
      %cst_24 = arith.constant dense<0.000000e+00> : vector<12xf32>
      %47 = vector.multi_reduction <add>, %46, %cst_24 [1] : vector<12x256xf32> to vector<12xf32>
      %48 = vector.shape_cast %47 : vector<12xf32> to vector<12x1xf32>
      %49 = vector.broadcast %43 : vector<12x1xf32> to vector<12x256xf32>
      %50 = arith.subf %41, %49 : vector<12x256xf32>
      %51 = arith.mulf %46, %50 : vector<12x256xf32>
      %cst_25 = arith.constant dense<0.000000e+00> : vector<12xf32>
      %52 = vector.multi_reduction <add>, %51, %cst_25 [1] : vector<12x256xf32> to vector<12xf32>
      %53 = vector.shape_cast %52 : vector<12xf32> to vector<12x1xf32>
      %54 = math.log %48 : vector<12x1xf32>
      %55 = arith.divf %53, %48 : vector<12x1xf32>
      %56 = arith.subf %54, %55 : vector<12x1xf32>
      %c0_26 = arith.constant 0 : index
      %c0_27 = arith.constant 0 : index
      %57 = vector.load %arg4[%c0_26, %c0_27] : memref<12x4xf32, #tpu.memory_space<vmem>>, vector<12x1xf32>
      %cst_28 = arith.constant dense<0.000000e+00> : vector<1xf32>
      %58 = vector.multi_reduction <add>, %57, %cst_28 [0] : vector<12x1xf32> to vector<1xf32>
      %59 = vector.shape_cast %58 : vector<1xf32> to vector<1x1xf32>
      %60 = arith.mulf %57, %56 : vector<12x1xf32>
      %cst_29 = arith.constant dense<0.000000e+00> : vector<1xf32>
      %61 = vector.multi_reduction <add>, %60, %cst_29 [0] : vector<12x1xf32> to vector<1xf32>
      %62 = vector.shape_cast %61 : vector<1xf32> to vector<1x1xf32>
      %63 = math.log %37 : vector<1x1xf32>
      %64 = arith.mulf %59, %63 : vector<1x1xf32>
      %65 = arith.divf %62, %64 : vector<1x1xf32>
      %c0_30 = arith.constant 0 : index
      %c0_31 = arith.constant 0 : index
      %c0_32 = arith.constant 0 : index
      %66 = vector.load %arg5[%c0_30, %c0_31, %c0_32] : memref<1x1x1xf32, #tpu.memory_space<vmem>>, vector<1x1x1xf32>
      %67 = vector.shape_cast %66 : vector<1x1x1xf32> to vector<1x1xf32>
      %68 = arith.addf %67, %65 : vector<1x1xf32>
      %c0_33 = arith.constant 0 : index
      %c0_34 = arith.constant 0 : index
      %c0_35 = arith.constant 0 : index
      %69 = vector.load %arg5[%c0_33, %c0_34, %c0_35] : memref<1x1x1xf32, #tpu.memory_space<vmem>>, vector<1x1x1xf32>
      %70 = vector.shape_cast %69 : vector<1x1x1xf32> to vector<1x1xf32>
      %71 = vector.shape_cast %68 : vector<1x1xf32> to vector<1x1x1xf32>
      tpu.vector_store %arg5[%c0_33, %c0_34, %c0_35], %71 {strides = array<i32>} : memref<1x1x1xf32, #tpu.memory_space<vmem>>, vector<1x1x1xf32>,
      %c0_36 = arith.constant 0 : index
      %c0_37 = arith.constant 0 : index
      %c0_38 = arith.constant 0 : index
      %72 = vector.load %arg6[%c0_36, %c0_37, %c0_38] : memref<1x1x1xf32, #tpu.memory_space<vmem>>, vector<1x1x1xf32>
      %73 = vector.shape_cast %72 : vector<1x1x1xf32> to vector<1x1xf32>
      %cst_39 = arith.constant 1.000000e+00 : f32
      %74 = vector.broadcast %cst_39 : f32 to vector<1x1xf32>
      %75 = arith.addf %73, %74 : vector<1x1xf32>
      %c0_40 = arith.constant 0 : index
      %c0_41 = arith.constant 0 : index
      %c0_42 = arith.constant 0 : index
      %76 = vector.load %arg6[%c0_40, %c0_41, %c0_42] : memref<1x1x1xf32, #tpu.memory_space<vmem>>, vector<1x1x1xf32>
      %77 = vector.shape_cast %76 : vector<1x1x1xf32> to vector<1x1xf32>
      %78 = vector.shape_cast %75 : vector<1x1xf32> to vector<1x1x1xf32>
      tpu.vector_store %arg6[%c0_40, %c0_41, %c0_42], %78 {strides = array<i32>} : memref<1x1x1xf32, #tpu.memory_space<vmem>>, vector<1x1x1xf32>,
    } else {
    }
    %17 = arith.index_cast %arg0 : i32 to index
    %c1 = arith.constant 1 : index
    %18 = memref.load %arg1[%17, %c1] : memref<2x4xi32, #tpu.memory_space<smem>>
    %c0_i32_14 = arith.constant 0 : i32
    %19 = arith.cmpi sgt, %18, %c0_i32_14 : i32
    %20 = arith.extui %19 : i1 to i32
    %c0_i32_15 = arith.constant 0 : i32
    %21 = arith.cmpi ne, %20, %c0_i32_15 : i32
    scf.if %21 {
      %c1_i32 = arith.constant 1 : i32
      %32 = vector.broadcast %c1_i32 : i32 to vector<1x256xi32>
      %33 = arith.cmpi eq, %9, %32 : vector<1x256xi32>
      %34 = arith.extui %33 : vector<1x256xi1> to vector<1x256xi32>
      %35 = arith.sitofp %34 : vector<1x256xi32> to vector<1x256xf32>
      %cst_20 = arith.constant dense<0.000000e+00> : vector<1xf32>
      %36 = vector.multi_reduction <add>, %35, %cst_20 [1] : vector<1x256xf32> to vector<1xf32>
      %37 = vector.shape_cast %36 : vector<1xf32> to vector<1x1xf32>
      %cst_21 = arith.constant -1.000000e+30 : f32
      %38 = vector.shape_cast %33 : vector<1x256xi1> to vector<1x256xi1>
      %39 = vector.broadcast %38 : vector<1x256xi1> to vector<12x256xi1>
      %40 = vector.broadcast %cst_21 : f32 to vector<12x256xf32>
      %41 = arith.select %39, %11, %40 : vector<12x256xi1>, vector<12x256xf32>
      %cst_22 = arith.constant dense<0xFF800000> : vector<12xf32>
      %42 = vector.multi_reduction <maximumf>, %41, %cst_22 [1] : vector<12x256xf32> to vector<12xf32>
      %43 = vector.shape_cast %42 : vector<12xf32> to vector<12x1xf32>
      %44 = vector.broadcast %43 : vector<12x1xf32> to vector<12x256xf32>
      %45 = arith.subf %41, %44 : vector<12x256xf32>
      %46 = math.exp %45 : vector<12x256xf32>
      %cst_23 = arith.constant dense<0.000000e+00> : vector<12xf32>
      %47 = vector.multi_reduction <add>, %46, %cst_23 [1] : vector<12x256xf32> to vector<12xf32>
      %48 = vector.shape_cast %47 : vector<12xf32> to vector<12x1xf32>
      %49 = vector.broadcast %43 : vector<12x1xf32> to vector<12x256xf32>
      %50 = arith.subf %41, %49 : vector<12x256xf32>
      %51 = arith.mulf %46, %50 : vector<12x256xf32>
      %cst_24 = arith.constant dense<0.000000e+00> : vector<12xf32>
      %52 = vector.multi_reduction <add>, %51, %cst_24 [1] : vector<12x256xf32> to vector<12xf32>
      %53 = vector.shape_cast %52 : vector<12xf32> to vector<12x1xf32>
      %54 = math.log %48 : vector<12x1xf32>
      %55 = arith.divf %53, %48 : vector<12x1xf32>
      %56 = arith.subf %54, %55 : vector<12x1xf32>
      %c0_25 = arith.constant 0 : index
      %c1_26 = arith.constant 1 : index
      %57 = vector.load %arg4[%c0_25, %c1_26] : memref<12x4xf32, #tpu.memory_space<vmem>>, vector<12x1xf32>
      %cst_27 = arith.constant dense<0.000000e+00> : vector<1xf32>
      %58 = vector.multi_reduction <add>, %57, %cst_27 [0] : vector<12x1xf32> to vector<1xf32>
      %59 = vector.shape_cast %58 : vector<1xf32> to vector<1x1xf32>
      %60 = arith.mulf %57, %56 : vector<12x1xf32>
      %cst_28 = arith.constant dense<0.000000e+00> : vector<1xf32>
      %61 = vector.multi_reduction <add>, %60, %cst_28 [0] : vector<12x1xf32> to vector<1xf32>
      %62 = vector.shape_cast %61 : vector<1xf32> to vector<1x1xf32>
      %63 = math.log %37 : vector<1x1xf32>
      %64 = arith.mulf %59, %63 : vector<1x1xf32>
      %65 = arith.divf %62, %64 : vector<1x1xf32>
      %c0_29 = arith.constant 0 : index
      %c0_30 = arith.constant 0 : index
      %c0_31 = arith.constant 0 : index
      %66 = vector.load %arg5[%c0_29, %c0_30, %c0_31] : memref<1x1x1xf32, #tpu.memory_space<vmem>>, vector<1x1x1xf32>
      %67 = vector.shape_cast %66 : vector<1x1x1xf32> to vector<1x1xf32>
      %68 = arith.addf %67, %65 : vector<1x1xf32>
      %c0_32 = arith.constant 0 : index
      %c0_33 = arith.constant 0 : index
      %c0_34 = arith.constant 0 : index
      %69 = vector.load %arg5[%c0_32, %c0_33, %c0_34] : memref<1x1x1xf32, #tpu.memory_space<vmem>>, vector<1x1x1xf32>
      %70 = vector.shape_cast %69 : vector<1x1x1xf32> to vector<1x1xf32>
      %71 = vector.shape_cast %68 : vector<1x1xf32> to vector<1x1x1xf32>
      tpu.vector_store %arg5[%c0_32, %c0_33, %c0_34], %71 {strides = array<i32>} : memref<1x1x1xf32, #tpu.memory_space<vmem>>, vector<1x1x1xf32>,
      %c0_35 = arith.constant 0 : index
      %c0_36 = arith.constant 0 : index
      %c0_37 = arith.constant 0 : index
      %72 = vector.load %arg6[%c0_35, %c0_36, %c0_37] : memref<1x1x1xf32, #tpu.memory_space<vmem>>, vector<1x1x1xf32>
      %73 = vector.shape_cast %72 : vector<1x1x1xf32> to vector<1x1xf32>
      %cst_38 = arith.constant 1.000000e+00 : f32
      %74 = vector.broadcast %cst_38 : f32 to vector<1x1xf32>
      %75 = arith.addf %73, %74 : vector<1x1xf32>
      %c0_39 = arith.constant 0 : index
      %c0_40 = arith.constant 0 : index
      %c0_41 = arith.constant 0 : index
      %76 = vector.load %arg6[%c0_39, %c0_40, %c0_41] : memref<1x1x1xf32, #tpu.memory_space<vmem>>, vector<1x1x1xf32>
      %77 = vector.shape_cast %76 : vector<1x1x1xf32> to vector<1x1xf32>
      %78 = vector.shape_cast %75 : vector<1x1xf32> to vector<1x1x1xf32>
      tpu.vector_store %arg6[%c0_39, %c0_40, %c0_41], %78 {strides = array<i32>} : memref<1x1x1xf32, #tpu.memory_space<vmem>>, vector<1x1x1xf32>,
    } else {
    }
    %22 = arith.index_cast %arg0 : i32 to index
    %c2 = arith.constant 2 : index
    %23 = memref.load %arg1[%22, %c2] : memref<2x4xi32, #tpu.memory_space<smem>>
    %c0_i32_16 = arith.constant 0 : i32
    %24 = arith.cmpi sgt, %23, %c0_i32_16 : i32
    %25 = arith.extui %24 : i1 to i32
    %c0_i32_17 = arith.constant 0 : i32
    %26 = arith.cmpi ne, %25, %c0_i32_17 : i32
    scf.if %26 {
      %c2_i32 = arith.constant 2 : i32
      %32 = vector.broadcast %c2_i32 : i32 to vector<1x256xi32>
      %33 = arith.cmpi eq, %9, %32 : vector<1x256xi32>
      %34 = arith.extui %33 : vector<1x256xi1> to vector<1x256xi32>
      %35 = arith.sitofp %34 : vector<1x256xi32> to vector<1x256xf32>
      %cst_20 = arith.constant dense<0.000000e+00> : vector<1xf32>
      %36 = vector.multi_reduction <add>, %35, %cst_20 [1] : vector<1x256xf32> to vector<1xf32>
      %37 = vector.shape_cast %36 : vector<1xf32> to vector<1x1xf32>
      %cst_21 = arith.constant -1.000000e+30 : f32
      %38 = vector.shape_cast %33 : vector<1x256xi1> to vector<1x256xi1>
      %39 = vector.broadcast %38 : vector<1x256xi1> to vector<12x256xi1>
      %40 = vector.broadcast %cst_21 : f32 to vector<12x256xf32>
      %41 = arith.select %39, %11, %40 : vector<12x256xi1>, vector<12x256xf32>
      %cst_22 = arith.constant dense<0xFF800000> : vector<12xf32>
      %42 = vector.multi_reduction <maximumf>, %41, %cst_22 [1] : vector<12x256xf32> to vector<12xf32>
      %43 = vector.shape_cast %42 : vector<12xf32> to vector<12x1xf32>
      %44 = vector.broadcast %43 : vector<12x1xf32> to vector<12x256xf32>
      %45 = arith.subf %41, %44 : vector<12x256xf32>
      %46 = math.exp %45 : vector<12x256xf32>
      %cst_23 = arith.constant dense<0.000000e+00> : vector<12xf32>
      %47 = vector.multi_reduction <add>, %46, %cst_23 [1] : vector<12x256xf32> to vector<12xf32>
      %48 = vector.shape_cast %47 : vector<12xf32> to vector<12x1xf32>
      %49 = vector.broadcast %43 : vector<12x1xf32> to vector<12x256xf32>
      %50 = arith.subf %41, %49 : vector<12x256xf32>
      %51 = arith.mulf %46, %50 : vector<12x256xf32>
      %cst_24 = arith.constant dense<0.000000e+00> : vector<12xf32>
      %52 = vector.multi_reduction <add>, %51, %cst_24 [1] : vector<12x256xf32> to vector<12xf32>
      %53 = vector.shape_cast %52 : vector<12xf32> to vector<12x1xf32>
      %54 = math.log %48 : vector<12x1xf32>
      %55 = arith.divf %53, %48 : vector<12x1xf32>
      %56 = arith.subf %54, %55 : vector<12x1xf32>
      %c0_25 = arith.constant 0 : index
      %c2_26 = arith.constant 2 : index
      %57 = vector.load %arg4[%c0_25, %c2_26] : memref<12x4xf32, #tpu.memory_space<vmem>>, vector<12x1xf32>
      %cst_27 = arith.constant dense<0.000000e+00> : vector<1xf32>
      %58 = vector.multi_reduction <add>, %57, %cst_27 [0] : vector<12x1xf32> to vector<1xf32>
      %59 = vector.shape_cast %58 : vector<1xf32> to vector<1x1xf32>
      %60 = arith.mulf %57, %56 : vector<12x1xf32>
      %cst_28 = arith.constant dense<0.000000e+00> : vector<1xf32>
      %61 = vector.multi_reduction <add>, %60, %cst_28 [0] : vector<12x1xf32> to vector<1xf32>
      %62 = vector.shape_cast %61 : vector<1xf32> to vector<1x1xf32>
      %63 = math.log %37 : vector<1x1xf32>
      %64 = arith.mulf %59, %63 : vector<1x1xf32>
      %65 = arith.divf %62, %64 : vector<1x1xf32>
      %c0_29 = arith.constant 0 : index
      %c0_30 = arith.constant 0 : index
      %c0_31 = arith.constant 0 : index
      %66 = vector.load %arg5[%c0_29, %c0_30, %c0_31] : memref<1x1x1xf32, #tpu.memory_space<vmem>>, vector<1x1x1xf32>
      %67 = vector.shape_cast %66 : vector<1x1x1xf32> to vector<1x1xf32>
      %68 = arith.addf %67, %65 : vector<1x1xf32>
      %c0_32 = arith.constant 0 : index
      %c0_33 = arith.constant 0 : index
      %c0_34 = arith.constant 0 : index
      %69 = vector.load %arg5[%c0_32, %c0_33, %c0_34] : memref<1x1x1xf32, #tpu.memory_space<vmem>>, vector<1x1x1xf32>
      %70 = vector.shape_cast %69 : vector<1x1x1xf32> to vector<1x1xf32>
      %71 = vector.shape_cast %68 : vector<1x1xf32> to vector<1x1x1xf32>
      tpu.vector_store %arg5[%c0_32, %c0_33, %c0_34], %71 {strides = array<i32>} : memref<1x1x1xf32, #tpu.memory_space<vmem>>, vector<1x1x1xf32>,
      %c0_35 = arith.constant 0 : index
      %c0_36 = arith.constant 0 : index
      %c0_37 = arith.constant 0 : index
      %72 = vector.load %arg6[%c0_35, %c0_36, %c0_37] : memref<1x1x1xf32, #tpu.memory_space<vmem>>, vector<1x1x1xf32>
      %73 = vector.shape_cast %72 : vector<1x1x1xf32> to vector<1x1xf32>
      %cst_38 = arith.constant 1.000000e+00 : f32
      %74 = vector.broadcast %cst_38 : f32 to vector<1x1xf32>
      %75 = arith.addf %73, %74 : vector<1x1xf32>
      %c0_39 = arith.constant 0 : index
      %c0_40 = arith.constant 0 : index
      %c0_41 = arith.constant 0 : index
      %76 = vector.load %arg6[%c0_39, %c0_40, %c0_41] : memref<1x1x1xf32, #tpu.memory_space<vmem>>, vector<1x1x1xf32>
      %77 = vector.shape_cast %76 : vector<1x1x1xf32> to vector<1x1xf32>
      %78 = vector.shape_cast %75 : vector<1x1xf32> to vector<1x1x1xf32>
      tpu.vector_store %arg6[%c0_39, %c0_40, %c0_41], %78 {strides = array<i32>} : memref<1x1x1xf32, #tpu.memory_space<vmem>>, vector<1x1x1xf32>,
    } else {
    }
    %27 = arith.index_cast %arg0 : i32 to index
    %c3 = arith.constant 3 : index
    %28 = memref.load %arg1[%27, %c3] : memref<2x4xi32, #tpu.memory_space<smem>>
    %c0_i32_18 = arith.constant 0 : i32
    %29 = arith.cmpi sgt, %28, %c0_i32_18 : i32
    %30 = arith.extui %29 : i1 to i32
    %c0_i32_19 = arith.constant 0 : i32
    %31 = arith.cmpi ne, %30, %c0_i32_19 : i32
    scf.if %31 {
      %c3_i32 = arith.constant 3 : i32
      %32 = vector.broadcast %c3_i32 : i32 to vector<1x256xi32>
      %33 = arith.cmpi eq, %9, %32 : vector<1x256xi32>
      %34 = arith.extui %33 : vector<1x256xi1> to vector<1x256xi32>
      %35 = arith.sitofp %34 : vector<1x256xi32> to vector<1x256xf32>
      %cst_20 = arith.constant dense<0.000000e+00> : vector<1xf32>
      %36 = vector.multi_reduction <add>, %35, %cst_20 [1] : vector<1x256xf32> to vector<1xf32>
      %37 = vector.shape_cast %36 : vector<1xf32> to vector<1x1xf32>
      %cst_21 = arith.constant -1.000000e+30 : f32
      %38 = vector.shape_cast %33 : vector<1x256xi1> to vector<1x256xi1>
      %39 = vector.broadcast %38 : vector<1x256xi1> to vector<12x256xi1>
      %40 = vector.broadcast %cst_21 : f32 to vector<12x256xf32>
      %41 = arith.select %39, %11, %40 : vector<12x256xi1>, vector<12x256xf32>
      %cst_22 = arith.constant dense<0xFF800000> : vector<12xf32>
      %42 = vector.multi_reduction <maximumf>, %41, %cst_22 [1] : vector<12x256xf32> to vector<12xf32>
      %43 = vector.shape_cast %42 : vector<12xf32> to vector<12x1xf32>
      %44 = vector.broadcast %43 : vector<12x1xf32> to vector<12x256xf32>
      %45 = arith.subf %41, %44 : vector<12x256xf32>
      %46 = math.exp %45 : vector<12x256xf32>
      %cst_23 = arith.constant dense<0.000000e+00> : vector<12xf32>
      %47 = vector.multi_reduction <add>, %46, %cst_23 [1] : vector<12x256xf32> to vector<12xf32>
      %48 = vector.shape_cast %47 : vector<12xf32> to vector<12x1xf32>
      %49 = vector.broadcast %43 : vector<12x1xf32> to vector<12x256xf32>
      %50 = arith.subf %41, %49 : vector<12x256xf32>
      %51 = arith.mulf %46, %50 : vector<12x256xf32>
      %cst_24 = arith.constant dense<0.000000e+00> : vector<12xf32>
      %52 = vector.multi_reduction <add>, %51, %cst_24 [1] : vector<12x256xf32> to vector<12xf32>
      %53 = vector.shape_cast %52 : vector<12xf32> to vector<12x1xf32>
      %54 = math.log %48 : vector<12x1xf32>
      %55 = arith.divf %53, %48 : vector<12x1xf32>
      %56 = arith.subf %54, %55 : vector<12x1xf32>
      %c0_25 = arith.constant 0 : index
      %c3_26 = arith.constant 3 : index
      %57 = vector.load %arg4[%c0_25, %c3_26] : memref<12x4xf32, #tpu.memory_space<vmem>>, vector<12x1xf32>
      %cst_27 = arith.constant dense<0.000000e+00> : vector<1xf32>
      %58 = vector.multi_reduction <add>, %57, %cst_27 [0] : vector<12x1xf32> to vector<1xf32>
      %59 = vector.shape_cast %58 : vector<1xf32> to vector<1x1xf32>
      %60 = arith.mulf %57, %56 : vector<12x1xf32>
      %cst_28 = arith.constant dense<0.000000e+00> : vector<1xf32>
      %61 = vector.multi_reduction <add>, %60, %cst_28 [0] : vector<12x1xf32> to vector<1xf32>
      %62 = vector.shape_cast %61 : vector<1xf32> to vector<1x1xf32>
      %63 = math.log %37 : vector<1x1xf32>
      %64 = arith.mulf %59, %63 : vector<1x1xf32>
      %65 = arith.divf %62, %64 : vector<1x1xf32>
      %c0_29 = arith.constant 0 : index
      %c0_30 = arith.constant 0 : index
      %c0_31 = arith.constant 0 : index
      %66 = vector.load %arg5[%c0_29, %c0_30, %c0_31] : memref<1x1x1xf32, #tpu.memory_space<vmem>>, vector<1x1x1xf32>
      %67 = vector.shape_cast %66 : vector<1x1x1xf32> to vector<1x1xf32>
      %68 = arith.addf %67, %65 : vector<1x1xf32>
      %c0_32 = arith.constant 0 : index
      %c0_33 = arith.constant 0 : index
      %c0_34 = arith.constant 0 : index
      %69 = vector.load %arg5[%c0_32, %c0_33, %c0_34] : memref<1x1x1xf32, #tpu.memory_space<vmem>>, vector<1x1x1xf32>
      %70 = vector.shape_cast %69 : vector<1x1x1xf32> to vector<1x1xf32>
      %71 = vector.shape_cast %68 : vector<1x1xf32> to vector<1x1x1xf32>
      tpu.vector_store %arg5[%c0_32, %c0_33, %c0_34], %71 {strides = array<i32>} : memref<1x1x1xf32, #tpu.memory_space<vmem>>, vector<1x1x1xf32>,
      %c0_35 = arith.constant 0 : index
      %c0_36 = arith.constant 0 : index
      %c0_37 = arith.constant 0 : index
      %72 = vector.load %arg6[%c0_35, %c0_36, %c0_37] : memref<1x1x1xf32, #tpu.memory_space<vmem>>, vector<1x1x1xf32>
      %73 = vector.shape_cast %72 : vector<1x1x1xf32> to vector<1x1xf32>
      %cst_38 = arith.constant 1.000000e+00 : f32
      %74 = vector.broadcast %cst_38 : f32 to vector<1x1xf32>
      %75 = arith.addf %73, %74 : vector<1x1xf32>
      %c0_39 = arith.constant 0 : index
      %c0_40 = arith.constant 0 : index
      %c0_41 = arith.constant 0 : index
      %76 = vector.load %arg6[%c0_39, %c0_40, %c0_41] : memref<1x1x1xf32, #tpu.memory_space<vmem>>, vector<1x1x1xf32>
      %77 = vector.shape_cast %76 : vector<1x1x1xf32> to vector<1x1xf32>
      %78 = vector.shape_cast %75 : vector<1x1xf32> to vector<1x1x1xf32>
      tpu.vector_store %arg6[%c0_39, %c0_40, %c0_41], %78 {strides = array<i32>} : memref<1x1x1xf32, #tpu.memory_space<vmem>>, vector<1x1x1xf32>,
    } else {
    }
    return
  }
  func.func @transform_0(%arg0: i32, %arg1: memref<2x4xi32, #tpu.memory_space<smem>>) -> (i32, i32, i32) {
    %c0_i32 = arith.constant 0 : i32
    %c0_i32_0 = arith.constant 0 : i32
    %c0_i32_1 = arith.constant 0 : i32
    return %arg0, %c0_i32, %c0_i32_0 : i32, i32, i32
  }
  func.func @transform_1(%arg0: i32, %arg1: memref<2x4xi32, #tpu.memory_space<smem>>) -> (i32, i32, i32) {
    %c0_i32 = arith.constant 0 : i32
    %c0_i32_0 = arith.constant 0 : i32
    %c0_i32_1 = arith.constant 0 : i32
    return %arg0, %c0_i32, %c0_i32_0 : i32, i32, i32
  }
  func.func @transform_2(%arg0: i32, %arg1: memref<2x4xi32, #tpu.memory_space<smem>>) -> (i32, i32) {
    %c0_i32 = arith.constant 0 : i32
    %c0_i32_0 = arith.constant 0 : i32
    %c0_i32_1 = arith.constant 0 : i32
    return %c0_i32, %c0_i32_0 : i32, i32
  }
  func.func @transform_3(%arg0: i32, %arg1: memref<2x4xi32, #tpu.memory_space<smem>>) -> (i32, i32, i32) {
    %c0_i32 = arith.constant 0 : i32
    %c0_i32_0 = arith.constant 0 : i32
    %c0_i32_1 = arith.constant 0 : i32
    return %arg0, %c0_i32, %c0_i32_0 : i32, i32, i32
  }
  func.func @transform_4(%arg0: i32, %arg1: memref<2x4xi32, #tpu.memory_space<smem>>) -> (i32, i32, i32) {
    %c0_i32 = arith.constant 0 : i32
    %c0_i32_0 = arith.constant 0 : i32
    %c0_i32_1 = arith.constant 0 : i32
    return %arg0, %c0_i32, %c0_i32_0 : i32, i32, i32
  }
}

</mosaic_0001>

<bundles_post_ra>
// kernel: tpu_custom_call.1
= control target key start
LH: loop header
LB: loop body
LE: loop exit
PB: predicated region body
PF: predicated region fallthrough
CT: control target
= control target key end

     0   :  { %s1258_s0 = inlined_call_operand.vmem [shape: s32[2,4], index: 0, kind: input, shape index: {}]   ;;  %s1259_s1 = inlined_call_operand.vmem [shape: s32[2,1,256], index: 1, kind: input, shape index: {}]   ;;  %s1260_s2 = inlined_call_operand.vmem [shape: f32[2,12,256], index: 2, kind: input, shape index: {}]   ;;  %s1261_s3 = inlined_call_operand.vmem [shape: f32[12,4], index: 3, kind: input, shape index: {}]   ;;  %s1262_s4 = inlined_call_operand.vmem [shape: f32[2,1,1], index: 4, kind: output, shape index: {0}]   ;;  %s1263_s5 = inlined_call_operand.vmem [shape: f32[2,1,1], index: 5, kind: output, shape index: {1}]  }
   0x1   :  { %s11_s20 = sshll.u32 %s1258_s0, 4  ;;  %s12_s20 = int_to_ptr.vmem [resolvable:$true] %s11_s20 }
   0x2   :  { %s1001_s21 = scalar_lea.vmem %s12_s20, 32  ;;  %p1006_p1 = scmp.lt.s32.totalorder %s12_s20, %s12_s20 }
   0x3   :  { %p1002_p0 = scmp.ne.s32.totalorder %s12_s20, %s1001_s21  ;;  %p1007_p2 = scmp.lt.s32.totalorder %s1001_s21, %s1001_s21 }
   0x5   :  { %p1008_p3 = por %p1007_p2, %p1006_p1 }
   0x7   :  { %p1009_p4 = pnand %p1008_p3, %p1002_p0 }
   0x9   :  { %1012 = shalt.err (!%p1009_p4)  }
   0xa   :  { %s1023_s22 = smov [#allocation3]  }
   0xb   :  { %14 = dma.vmem_to_smem %s12_s20, 32, %s1023_s22, [#allocation2] }
   0xc   :  { %1017 = dma.done.wait [#allocation2], 32 }
   0xd   :  { %1018 = vsyncadd [#allocation2], 4294967264 }
   0xe   :  { %16 = sfence }
   0xf   :  { %s1072_s23 = smov 0  }
  0x10 LB: > { %s877_s0 = sadd.s32 4294967295, %s1021_s23   ;;  %p881_p5 = scmp.ge.s32.totalorder %s1021_s23, 1  ;;  %s1021_s23 = sphi %s1072_s23, %s22_s23  }
  0x11   : > { %p181_p6 = scmp.lt.s32.totalorder %s1021_s23, 3 }
  0x13   : > { %p182_p7 = pnand %p881_p5, %p181_p6 }
  0x14   : > { %p212_p8 = scmp.lt.s32.totalorder (!%p182_p7), %s877_s0, 1  ;;  %s1080_s24 = sshll.u32 (!%p182_p7), %s877_s0, 7  ;;  %vm227_vm0 = vcmask (!%p182_p7), 0   ;;  %v1024_v3 = vmov (!%p182_p7), 0.0  }
  0x15   : > { %185 = sbr.rel (%p182_p7) target bundleno = 1854 (0x73e), region = 32  ;;  %s236_s25 = sld [smem:[#allocation3 + %s1080_s24]] (!%p182_p7) }
  0x1b   : > { %p886_p9 = scmp.le.s32.totalorder (!%p182_p7), %s236_s25, 0 }
  0x1c   : > { %s1265_s0 = smov (!%p212_p8, %s877_s0), 1  ;;  %v245_v6 = vlaneseq (!%p886_p9)  ;;  %v1025_v8 = vmov (!%p886_p9), 0   ;;  %vm278_vm2 = vcmask (!%p886_p9), 1043456   ;;  %v1026_v22 = vmov (!%p886_p9), 0.0   ;;  %v326_v57 = vld [vmem:[%s1261_s3] sm:$0xff] (!%p886_p9) }
  0x1d   : > { %s882_s26 = sshll.u32 %s1265_s0, 1  ;;  %s896_s27 = sshll.u32 %s1265_s0, 5  ;;  %vm255_vm5 = vcmask (!%p886_p9), 1040384   ;;  %v327_v58 = vld [vmem:[%s1261_s3 + $0x8] sm:$0xf] (!%p886_p9)  ;;  %vm328_vm6 = vcmask (!%p886_p9), 7168  }
  0x1e   : > { %s215_s30 = scalar_lea.vmem %s1259_s1, %s882_s26  ;;  %s220_s8 = scalar_lea.vmem %s1260_s2, %s896_s27  ;;  %v246_v7 = vshrl.u32 (!%p886_p9), %v245_v6, 7  ;;  %vm330_vm7 = vcmask (!%p886_p9), 3072   ;;  %v329_v59 = vsel (!%p886_p9), %vm328_vm6, %v326_v57, 0.0 }
  0x1f   : > { %s1092_s11 = scalar_lea.vmem %s1262_s4, %s1265_s0  ;;  %v1094_v0 = vld [vmem:[%s215_s30] sm:$0x3]  ;;  %v1098_v2 = vld [vmem:[%s220_s8 + $0x8] sm:$0xff]  ;;  %s1103_s14 = scalar_lea.vmem %s1263_s5, %s1265_s0  ;;  %v1107_v4 = vld [vmem:[%s220_s8 + $0x10] sm:$0xf]  ;;  %v331_v60 = vsel (!%p886_p9), %vm330_vm7, %v327_v58, 0.0 }
  0x20   : > { %v1096_v1 = vld [vmem:[%s220_s8] sm:$0xff]  ;;  %228 = vst.msk [vmem:[%s1092_s11] sm:$0x1] %vm227_vm0, %v1024_v3  ;;  %v1109_v5 = vld [vmem:[%s220_s8 + $0x18] sm:$0xf]  ;;  %240 = sbr.rel (%p886_p9) target bundleno = 390 (0x186), region = 36  ;;  %v332_v61 = vadd.f32 (!%p886_p9), %v331_v60, %v329_v59 }
  0x21   : > { %229 = vst.msk [vmem:[%s1103_s14] sm:$0x1] %vm227_vm0, %v1024_v3  ;;  %vm241_vm1 = vcmp.eq.s32.totalorder (!%p886_p9), %v1094_v0, 0  ;;  %v247_v10 = vsub.s32 (!%p886_p9), 0, %v246_v7  ;;  %v251_v11 = vsub.s32 (!%p886_p9), 1, %v246_v7 }
  0x22   : > { %v242_v9 = vsel (!%p886_p9), %vm241_vm1, 1, %v1025_v8  ;;  %v887_v23 = vsel (!%p886_p9), %vm241_vm1, 1.0, %v1026_v22  ;;  %v333_v62 = vrot.slane (!%p886_p9), %v332_v61, 4 }
  0x23   : > { %v264_v12 = vrot.slane (!%p886_p9), %v242_v9, %v247_v10  ;;  %v268_v13 = vrot.slane (!%p886_p9), %v242_v9, %v251_v11  ;;  %v248_v24 = vrot.slane (!%p886_p9), %v887_v23, %v247_v10  ;;  %v252_v25 = vrot.slane (!%p886_p9), %v887_v23, %v251_v11 }
  0x24   : > { %v334_v3 = vadd.f32 (!%p886_p9), %v333_v62, %v332_v61 }
  0x25   : > { %vm269_vm3 = vcmp.eq.s32.totalorder (!%p886_p9), %v264_v12, 1  ;;  %vm270_vm4 = vcmp.eq.s32.totalorder (!%p886_p9), %v268_v13, 1  ;;  %v256_v26 = vsel (!%p886_p9), %vm255_vm5, %v248_v24, 0.0  ;;  %v257_v27 = vsel (!%p886_p9), %vm255_vm5, %v252_v25, 0.0 }
  0x26   : > { %v273_v14 = vsel (!%p886_p9), %vm269_vm3, %v1107_v4, -1e+30  ;;  %v274_v15 = vsel (!%p886_p9), %vm270_vm4, %v1109_v5, -1e+30  ;;  %v271_v18 = vsel (!%p886_p9), %vm269_vm3, %v1096_v1, -1e+30  ;;  %v258_v28 = vadd.f32 (!%p886_p9), %v257_v27, %v256_v26 }
  0x27   : > { %v279_v16 = vsel %vm278_vm2, %v273_v14, -inf  ;;  %v280_v17 = vsel %vm278_vm2, %v274_v15, -inf  ;;  %v272_v19 = vsel %vm270_vm4, %v1098_v2, -1e+30  ;;  %v335_v8 = vrot.slane %v334_v3, 2 }
  0x28   : > { %v281_v20 = vmax.f32 %v279_v16, %v280_v17  ;;  %v275_v21 = vmax.f32 %v271_v18, %v272_v19  ;;  %v358_v55 = vld [vmem:[%s1103_s14] sm:$0x1] }
  0x29   : > { %v359_v56 = vadd.f32 1.0, %v358_v55  ;;  %v336_v9 = vadd.f32 %v335_v8, %v334_v3 }
  0x2a   : > { %282 = vmax.xlane.f32.xlu0 %v281_v20 }
  0x2b   : > { %360 = vst.msk [vmem:[%s1103_s14] sm:$0x1] %vm227_vm0, %v359_v56 }
  0x2e   : > { %276 = vmax.xlane.f32.xlu0 %v275_v21 }
  0x32   : > { %259 = vadd.xlane.f32.xlu0 %v258_v28 }
  0xb7   : > { %v283_v29 = vpop.xlane.xlu0 %282 }
  0xb8   : > { %v286_v30 = vsub.f32 %v273_v14, %v283_v29  ;;  %v287_v31 = vsub.f32 %v274_v15, %v283_v29  ;;  %v337_v14 = vrot.slane %v336_v9, 1 }
  0xba   : > { %v292_v32 = vmul.f32 1.442695, %v286_v30  ;;  %v294_v33 = vmul.f32 1.442695, %v287_v31  ;;  %v338_v22 = vadd.f32 %v337_v14, %v336_v9 }
  0xbb   : > { %v277_v34 = vpop.xlane.xlu0 %276 }
  0xbc   : > { %921 = vpow2.f32 %v292_v32  ;;  %v284_v35 = vsub.f32 %v271_v18, %v277_v34  ;;  %v285_v36 = vsub.f32 %v272_v19, %v277_v34 }
  0xbd   : > { %923 = vpow2.f32 %v294_v33 }
  0xbe   : > { %v288_v37 = vmul.f32 1.442695, %v284_v35  ;;  %v290_v38 = vmul.f32 1.442695, %v285_v36 }
  0xbf   : > { %v260_v6 = vpop.xlane.xlu0 %259 }
  0xc0   : > { %925 = vpow2.f32 %v288_v37 }
  0xc1   : > { %927 = vpow2.f32 %v290_v38 }
  0xc6   : > { %v922_v39 = vpop.eup %921 }
  0xc7   : > { %v924_v40 = vpop.eup %923  ;;  %v306_v41 = vmul.f32 %v922_v39, %v286_v30  ;;  %v299_v49 = vsel %vm278_vm2, %v922_v39, 0.0  ;;  %v355_v39 = vld [vmem:[%s1092_s11] sm:$0x1] }
  0xc8   : > { %v307_v42 = vmul.f32 %v924_v40, %v287_v31  ;;  %v300_v50 = vsel %vm278_vm2, %v924_v40, 0.0 }
  0xc9   : > { %v311_v43 = vsel %vm278_vm2, %v306_v41, 0.0  ;;  %v301_v51 = vadd.f32 %v300_v50, %v299_v49 }
  0xca   : > { %v926_v44 = vpop.eup %925  ;;  %v312_v45 = vsel %vm278_vm2, %v307_v42, 0.0 }
  0xcb   : > { %v928_v46 = vpop.eup %927  ;;  %v313_v47 = vadd.f32 %v312_v45, %v311_v43  ;;  %v304_v52 = vmul.f32 %v926_v44, %v284_v35 }
  0xcc   : > { %v296_v48 = vadd.f32 %v928_v46, %v926_v44  ;;  %v305_v53 = vmul.f32 %v928_v46, %v285_v36 }
  0xcd   : > { %314 = vadd.xlane.f32.xlu0 %v313_v47 }
  0xce   : > { %297 = vadd.xlane.f32.xlu1 %v296_v48  ;;  %v308_v54 = vadd.f32 %v305_v53, %v304_v52 }
  0xd2   : > { %302 = vadd.xlane.f32.xlu1 %v301_v51 }
  0xd6   : > { %309 = vadd.xlane.f32.xlu1 %v308_v54 }
 0x15a   : > { %v315_v20 = vpop.xlane.xlu0 %314 }
 0x15b   : > { %v298_v63 = vpop.xlane.xlu1 %297 }
 0x15c   : > { %929 = vlog2.f32 %v298_v63 }
 0x15d   : > { %931 = vrcp.f32 %v298_v63 }
 0x15e   : > { %933 = vlog2.f32 %v260_v6 }
 0x15f   : > { %v303_v7 = vpop.xlane.xlu1 %302 }
 0x160   : > { %935 = vlog2.f32 %v303_v7 }
 0x161   : > { %937 = vrcp.f32 %v303_v7 }
 0x163   : > { %v310_v13 = vpop.xlane.xlu1 %309 }
 0x166   : > { %v930_v10 = vpop.eup %929 }
 0x167   : > { %v932_v11 = vpop.eup %931  ;;  %v317_v12 = vmul.f32 0.6931472, %v930_v10 }
 0x168   : > { %v321_v15 = vmul.f32 %v932_v11, %v310_v13  ;;  %v934_v16 = vpop.eup %933 }
 0x169   : > { %v351_v23 = vmul.f32 0.6931472, %v934_v16 }
 0x16a   : > { %v936_v17 = vpop.eup %935  ;;  %v324_v18 = vsub.f32 %v317_v12, %v321_v15 }
 0x16b   : > { %v938_v19 = vpop.eup %937  ;;  %v319_v21 = vmul.f32 0.6931472, %v936_v17  ;;  %v352_v27 = vmul.f32 %v351_v23, %v338_v22 }
 0x16c   : > { %v323_v24 = vmul.f32 %v938_v19, %v315_v20  ;;  %v339_v26 = vmul.f32 %v326_v57, %v324_v18 }
 0x16d   : > { %939 = vrcp.f32 %v352_v27 }
 0x16e   : > { %v325_v25 = vsub.f32 %v319_v21, %v323_v24  ;;  %v341_v29 = vsel %vm328_vm6, %v339_v26, 0.0 }
 0x170   : > { %v340_v28 = vmul.f32 %v327_v58, %v325_v25 }
 0x172   : > { %v342_v30 = vsel %vm330_vm7, %v340_v28, 0.0 }
 0x173   : > { %v343_v31 = vadd.f32 %v342_v30, %v341_v29 }
 0x175   : > { %v344_v32 = vrot.slane %v343_v31, 4 }
 0x177   : > { %v345_v33 = vadd.f32 %v344_v32, %v343_v31  ;;  %v940_v37 = vpop.eup %939 }
 0x179   : > { %v346_v34 = vrot.slane %v345_v33, 2 }
 0x17b   : > { %v347_v35 = vadd.f32 %v346_v34, %v345_v33 }
 0x17d   : > { %v348_v36 = vrot.slane %v347_v35, 1 }
 0x17f   : > { %v349_v38 = vadd.f32 %v348_v36, %v347_v35 }
 0x181   : > { %v354_v40 = vmul.f32 %v940_v37, %v349_v38 }
 0x183   : > { %v356_v41 = vadd.f32 %v355_v39, %v354_v40 }
 0x185   : > { %357 = vst.msk [vmem:[%s1092_s11] sm:$0x1] %vm227_vm0, %v356_v41 }
 0x186 PF: > { %s361_s19 = sadd.s32 1, %s1080_s24 }
 0x187   : > { %s362_s20 = sld [smem:[#allocation3 + %s361_s19]] }
 0x18d   : > { %p888_p10 = scmp.le.s32.totalorder %s362_s20, 0 }
 0x18e   : > { %vm367_vm8 = vcmp.eq.s32.totalorder (!%p888_p10), %v1094_v0, 1  ;;  %v371_v42 = vlaneseq (!%p888_p10)  ;;  %v1027_v44 = vmov (!%p888_p10), 0   ;;  %vm404_vm9 = vcmask (!%p888_p10), 1043456   ;;  %v452_v32 = vld [vmem:[%s1261_s3] sm:$0xff] (!%p888_p10)  ;;  %v453_v33 = vld [vmem:[%s1261_s3 + $0x8] sm:$0xf] (!%p888_p10) }
 0x18f   : > { %366 = sbr.rel (%p888_p10) target bundleno = 878 (0x36e), region = 40  ;;  %v368_v45 = vsel (!%p888_p10), %vm367_vm8, 1, %v1027_v44  ;;  %v1028_v58 = vmov (!%p888_p10), 0.0   ;;  %vm381_vm12 = vcmask (!%p888_p10), 1040384   ;;  %vm454_vm13 = vcmask (!%p888_p10), 15368   ;;  %s1030_s26 = smov (!%p888_p10), 127  }
 0x190   : > { %v1146_v43 = vshrl.u32 (!%p888_p10), %v371_v42, 7  ;;  %v889_v59 = vsel (!%p888_p10), %vm367_vm8, 1.0, %v1028_v58  ;;  %vm456_vm14 = vcmask (!%p888_p10), 11272   ;;  %v455_v34 = vsel (!%p888_p10), %vm454_vm13, %v452_v32, 0.0 }
 0x191   : > { %v457_v35 = vsel (!%p888_p10), %vm456_vm14, %v453_v33, 0.0 }
 0x192   : > { %v373_v46 = vsub.s32 (!%p888_p10), 0, %v1146_v43  ;;  %v377_v47 = vsub.s32 (!%p888_p10), 1, %v1146_v43  ;;  %v458_v36 = vadd.f32 (!%p888_p10), %v457_v35, %v455_v34 }
 0x194   : > { %v390_v48 = vrot.slane (!%p888_p10), %v368_v45, %v373_v46  ;;  %v394_v49 = vrot.slane (!%p888_p10), %v368_v45, %v377_v47  ;;  %v374_v60 = vrot.slane (!%p888_p10), %v889_v59, %v373_v46  ;;  %v378_v61 = vrot.slane (!%p888_p10), %v889_v59, %v377_v47 }
 0x195   : > { %v459_v37 = vrot.slane (!%p888_p10), %v458_v36, 4 }
 0x196   : > { %vm395_vm10 = vcmp.eq.s32.totalorder %v390_v48, 1  ;;  %vm396_vm11 = vcmp.eq.s32.totalorder %v394_v49, 1  ;;  %v382_v62 = vsel %vm381_vm12, %v374_v60, 0.0  ;;  %v383_v63 = vsel %vm381_vm12, %v378_v61, 0.0 }
 0x197   : > { %v399_v50 = vsel %vm395_vm10, %v1107_v4, -1e+30  ;;  %v400_v51 = vsel %vm396_vm11, %v1109_v5, -1e+30  ;;  %v397_v54 = vsel %vm395_vm10, %v1096_v1, -1e+30  ;;  %v384_v3 = vadd.f32 %v383_v63, %v382_v62 }
 0x198   : > { %v405_v52 = vsel %vm404_vm9, %v399_v50, -inf  ;;  %v406_v53 = vsel %vm404_vm9, %v400_v51, -inf  ;;  %v398_v55 = vsel %vm396_vm11, %v1098_v2, -1e+30  ;;  %v460_v39 = vadd.f32 %v459_v37, %v458_v36 }
 0x199   : > { %v407_v56 = vmax.f32 %v405_v52, %v406_v53  ;;  %v401_v57 = vmax.f32 %v397_v54, %v398_v55 }
 0x19a   : > { %v461_v42 = vrot.slane %v460_v39, 2 }
 0x19b   : > { %408 = vmax.xlane.f32.xlu0 %v407_v56 }
 0x19c   : > { %v462_v44 = vadd.f32 %v461_v42, %v460_v39 }
 0x19e   : > { %v463_v49 = vrot.slane %v462_v44, 1 }
 0x19f   : > { %402 = vmax.xlane.f32.xlu0 %v401_v57 }
 0x1a0   : > { %v464_v57 = vadd.f32 %v463_v49, %v462_v44 }
 0x1a3   : > { %385 = vadd.xlane.f32.xlu0 %v384_v3 }
 0x228   : > { %v409_v6 = vpop.xlane.xlu0 %408 }
 0x229   : > { %v412_v7 = vsub.f32 %v399_v50, %v409_v6  ;;  %v413_v8 = vsub.f32 %v400_v51, %v409_v6 }
 0x22b   : > { %v418_v9 = vmul.f32 1.442695, %v412_v7  ;;  %v420_v10 = vmul.f32 1.442695, %v413_v8 }
 0x22c   : > { %v403_v11 = vpop.xlane.xlu0 %402 }
 0x22d   : > { %941 = vpow2.f32 %v418_v9  ;;  %v410_v12 = vsub.f32 %v397_v54, %v403_v11  ;;  %v411_v13 = vsub.f32 %v398_v55, %v403_v11 }
 0x22e   : > { %943 = vpow2.f32 %v420_v10  ;;  %v1029_v10 = vmov 1966171168  }
 0x22f   : > { %v414_v14 = vmul.f32 1.442695, %v410_v12  ;;  %v416_v15 = vmul.f32 1.442695, %v411_v13  ;;  %v484_v11 = vunpack.c.l.s4 %v1029_v10 }
 0x230   : > { %v386_v40 = vpop.xlane.xlu0 %385 }
 0x231   : > { %945 = vpow2.f32 %v414_v14 }
 0x232   : > { %947 = vpow2.f32 %v416_v15 }
 0x237   : > { %v942_v16 = vpop.eup %941 }
 0x238   : > { %v944_v17 = vpop.eup %943  ;;  %v432_v18 = vmul.f32 %v942_v16, %v412_v7  ;;  %v425_v26 = vsel %vm404_vm9, %v942_v16, 0.0  ;;  %v485_v16 = vunpack.c.0.s8 %v484_v11 }
 0x239   : > { %v433_v19 = vmul.f32 %v944_v17, %v413_v8  ;;  %v426_v27 = vsel %vm404_vm9, %v944_v17, 0.0 }
 0x23a   : > { %v437_v20 = vsel %vm404_vm9, %v432_v18, 0.0  ;;  %v427_v28 = vadd.f32 %v426_v27, %v425_v26 }
 0x23b   : > { %v946_v21 = vpop.eup %945  ;;  %v438_v22 = vsel %vm404_vm9, %v433_v19, 0.0 }
 0x23c   : > { %v948_v23 = vpop.eup %947  ;;  %v439_v24 = vadd.f32 %v438_v22, %v437_v20  ;;  %v430_v29 = vmul.f32 %v946_v21, %v410_v12  ;;  %v488_v20 = vsub.s32 %v485_v16, %v1146_v43 }
 0x23d   : > { %v422_v25 = vadd.f32 %v948_v23, %v946_v21  ;;  %v431_v30 = vmul.f32 %v948_v23, %v411_v13  ;;  %v502_v13 = vld [vmem:[%s1103_s14] sm:$0x1] }
 0x23e   : > { %440 = vadd.xlane.f32.xlu0 %v439_v24  ;;  %v503_v14 = vadd.f32 1.0, %v502_v13  ;;  %v481_v24 = vld [vmem:[%s1092_s11] sm:$0x1] }
 0x23f   : > { %423 = vadd.xlane.f32.xlu1 %v422_v25  ;;  %v434_v31 = vadd.f32 %v431_v30, %v430_v29 }
 0x240   : > { %504 = vst.msk [vmem:[%s1103_s14] sm:$0x1] %vm227_vm0, %v503_v14 }
 0x243   : > { %428 = vadd.xlane.f32.xlu1 %v427_v28 }
 0x247   : > { %435 = vadd.xlane.f32.xlu1 %v434_v31 }
 0x2cb   : > { %v441_v55 = vpop.xlane.xlu0 %440 }
 0x2cc   : > { %v424_v38 = vpop.xlane.xlu1 %423 }
 0x2cd   : > { %949 = vlog2.f32 %v424_v38 }
 0x2ce   : > { %951 = vrcp.f32 %v424_v38 }
 0x2cf   : > { %953 = vlog2.f32 %v386_v40 }
 0x2d0   : > { %v429_v41 = vpop.xlane.xlu1 %428 }
 0x2d1   : > { %955 = vlog2.f32 %v429_v41 }
 0x2d2   : > { %957 = vrcp.f32 %v429_v41 }
 0x2d4   : > { %v436_v48 = vpop.xlane.xlu1 %435 }
 0x2d7   : > { %v950_v45 = vpop.eup %949 }
 0x2d8   : > { %v952_v46 = vpop.eup %951  ;;  %v443_v47 = vmul.f32 0.6931472, %v950_v45 }
 0x2d9   : > { %v447_v50 = vmul.f32 %v952_v46, %v436_v48  ;;  %v954_v51 = vpop.eup %953 }
 0x2da   : > { %v477_v58 = vmul.f32 0.6931472, %v954_v51 }
 0x2db   : > { %v956_v52 = vpop.eup %955  ;;  %v450_v53 = vsub.f32 %v443_v47, %v447_v50 }
 0x2dc   : > { %v958_v54 = vpop.eup %957  ;;  %v445_v56 = vmul.f32 0.6931472, %v956_v52  ;;  %v478_v62 = vmul.f32 %v477_v58, %v464_v57 }
 0x2dd   : > { %v449_v59 = vmul.f32 %v958_v54, %v441_v55  ;;  %v465_v61 = vmul.f32 %v452_v32, %v450_v53 }
 0x2de   : > { %959 = vrcp.f32 %v478_v62 }
 0x2df   : > { %v451_v60 = vsub.f32 %v445_v56, %v449_v59  ;;  %v467_v3 = vsel %vm454_vm13, %v465_v61, 0.0 }
 0x2e1   : > { %v466_v63 = vmul.f32 %v453_v33, %v451_v60 }
 0x2e3   : > { %v468_v6 = vsel %vm456_vm14, %v466_v63, 0.0 }
 0x2e4   : > { %v469_v7 = vadd.f32 %v468_v6, %v467_v3 }
 0x2e6   : > { %v470_v8 = vrot.slane %v469_v7, 4 }
 0x2e8   : > { %v471_v9 = vadd.f32 %v470_v8, %v469_v7  ;;  %v960_v18 = vpop.eup %959 }
 0x2ea   : > { %v472_v12 = vrot.slane %v471_v9, 2 }
 0x2ec   : > { %v473_v15 = vadd.f32 %v472_v12, %v471_v9 }
 0x2ee   : > { %v474_v17 = vrot.slane %v473_v15, 1 }
 0x2f0   : > { %v475_v19 = vadd.f32 %v474_v17, %v473_v15 }
 0x2f2   : > { %v480_v21 = vmul.f32 %v960_v18, %v475_v19 }
 0x2f4   : > { %v489_v22 = vrot.slane %v480_v21, %v488_v20 }
 0x2f6   : > { %v496_v23 = vrot.slane %v489_v22, %v488_v20 }
 0x2f8   : > { %497 = vrot.lane.b32.xlu1 %v496_v23, %s1030_s26 }
 0x36a   : > { %v498_v25 = vpop.permute.xlu1 %497 }
 0x36b   : > { %v500_v26 = vadd.f32 %v498_v25, %v481_v24 }
 0x36d   : > { %501 = vst.msk [vmem:[%s1092_s11] sm:$0x1] %vm227_vm0, %v500_v26 }
 0x36e PF: > { %s505_s27 = sadd.s32 2, %s1080_s24 }
 0x36f   : > { %s506_s28 = sld [smem:[#allocation3 + %s505_s27]] }
 0x375   : > { %p890_p11 = scmp.le.s32.totalorder %s506_s28, 0 }
 0x376   : > { %vm511_vm15 = vcmp.eq.s32.totalorder (!%p890_p11), %v1094_v0, 2  ;;  %v515_v27 = vlaneseq (!%p890_p11)  ;;  %v1031_v28 = vmov (!%p890_p11), 0   ;;  %vm548_vm1 = vcmask (!%p890_p11), 1043456   ;;  %v596_v17 = vld [vmem:[%s1261_s3] sm:$0xff] (!%p890_p11)  ;;  %v597_v18 = vld [vmem:[%s1261_s3 + $0x8] sm:$0xf] (!%p890_p11) }
 0x377   : > { %510 = sbr.rel (%p890_p11) target bundleno = 1366 (0x556), region = 44  ;;  %v512_v29 = vsel (!%p890_p11), %vm511_vm15, 1, %v1031_v28  ;;  %v1032_v42 = vmov (!%p890_p11), 0.0   ;;  %vm525_vm4 = vcmask (!%p890_p11), 1040384   ;;  %vm598_vm5 = vcmask (!%p890_p11), 23568   ;;  %s1034_s8 = smov (!%p890_p11), 126  }
 0x378   : > { %v1183_v43 = vshrl.u32 (!%p890_p11), %v515_v27, 7  ;;  %v891_v44 = vsel (!%p890_p11), %vm511_vm15, 1.0, %v1032_v42  ;;  %vm600_vm6 = vcmask (!%p890_p11), 19472   ;;  %v599_v19 = vsel (!%p890_p11), %vm598_vm5, %v596_v17, 0.0 }
 0x379   : > { %v601_v20 = vsel (!%p890_p11), %vm600_vm6, %v597_v18, 0.0 }
 0x37a   : > { %v517_v30 = vsub.s32 (!%p890_p11), 0, %v1183_v43  ;;  %v521_v31 = vsub.s32 (!%p890_p11), 1, %v1183_v43  ;;  %v602_v21 = vadd.f32 (!%p890_p11), %v601_v20, %v599_v19 }
 0x37c   : > { %v534_v32 = vrot.slane (!%p890_p11), %v512_v29, %v517_v30  ;;  %v538_v33 = vrot.slane (!%p890_p11), %v512_v29, %v521_v31  ;;  %v518_v45 = vrot.slane (!%p890_p11), %v891_v44, %v517_v30  ;;  %v522_v46 = vrot.slane (!%p890_p11), %v891_v44, %v521_v31 }
 0x37d   : > { %v603_v22 = vrot.slane (!%p890_p11), %v602_v21, 4 }
 0x37e   : > { %vm539_vm2 = vcmp.eq.s32.totalorder %v534_v32, 1  ;;  %vm540_vm3 = vcmp.eq.s32.totalorder %v538_v33, 1  ;;  %v526_v47 = vsel %vm525_vm4, %v518_v45, 0.0  ;;  %v527_v48 = vsel %vm525_vm4, %v522_v46, 0.0 }
 0x37f   : > { %v543_v34 = vsel %vm539_vm2, %v1107_v4, -1e+30  ;;  %v544_v35 = vsel %vm540_vm3, %v1109_v5, -1e+30  ;;  %v541_v38 = vsel %vm539_vm2, %v1096_v1, -1e+30  ;;  %v528_v49 = vadd.f32 %v527_v48, %v526_v47 }
 0x380   : > { %v549_v36 = vsel %vm548_vm1, %v543_v34, -inf  ;;  %v550_v37 = vsel %vm548_vm1, %v544_v35, -inf  ;;  %v542_v39 = vsel %vm540_vm3, %v1098_v2, -1e+30  ;;  %v604_v24 = vadd.f32 %v603_v22, %v602_v21 }
 0x381   : > { %v551_v40 = vmax.f32 %v549_v36, %v550_v37  ;;  %v545_v41 = vmax.f32 %v541_v38, %v542_v39 }
 0x382   : > { %v605_v27 = vrot.slane %v604_v24, 2 }
 0x383   : > { %552 = vmax.xlane.f32.xlu0 %v551_v40 }
 0x384   : > { %v606_v28 = vadd.f32 %v605_v27, %v604_v24 }
 0x386   : > { %v607_v33 = vrot.slane %v606_v28, 1 }
 0x387   : > { %546 = vmax.xlane.f32.xlu0 %v545_v41 }
 0x388   : > { %v608_v41 = vadd.f32 %v607_v33, %v606_v28 }
 0x38b   : > { %529 = vadd.xlane.f32.xlu0 %v528_v49 }
 0x410   : > { %v553_v50 = vpop.xlane.xlu0 %552 }
 0x411   : > { %v556_v51 = vsub.f32 %v543_v34, %v553_v50  ;;  %v557_v52 = vsub.f32 %v544_v35, %v553_v50 }
 0x413   : > { %v562_v53 = vmul.f32 1.442695, %v556_v51  ;;  %v564_v54 = vmul.f32 1.442695, %v557_v52 }
 0x414   : > { %v547_v55 = vpop.xlane.xlu0 %546 }
 0x415   : > { %961 = vpow2.f32 %v562_v53  ;;  %v554_v56 = vsub.f32 %v541_v38, %v547_v55  ;;  %v555_v57 = vsub.f32 %v542_v39, %v547_v55 }
 0x416   : > { %963 = vpow2.f32 %v564_v54  ;;  %v1033_v54 = vmov 1966171168  }
 0x417   : > { %v558_v58 = vmul.f32 1.442695, %v554_v56  ;;  %v560_v59 = vmul.f32 1.442695, %v555_v57  ;;  %v628_v55 = vunpack.c.l.s4 %v1033_v54 }
 0x418   : > { %v530_v25 = vpop.xlane.xlu0 %529 }
 0x419   : > { %965 = vpow2.f32 %v558_v58 }
 0x41a   : > { %967 = vpow2.f32 %v560_v59 }
 0x41f   : > { %v962_v60 = vpop.eup %961 }
 0x420   : > { %v964_v61 = vpop.eup %963  ;;  %v576_v62 = vmul.f32 %v962_v60, %v556_v51  ;;  %v569_v11 = vsel %vm548_vm1, %v962_v60, 0.0  ;;  %v629_v60 = vunpack.c.0.s8 %v628_v55 }
 0x421   : > { %v577_v63 = vmul.f32 %v964_v61, %v557_v52  ;;  %v570_v12 = vsel %vm548_vm1, %v964_v61, 0.0 }
 0x422   : > { %v581_v3 = vsel %vm548_vm1, %v576_v62, 0.0  ;;  %v571_v13 = vadd.f32 %v570_v12, %v569_v11 }
 0x423   : > { %v966_v6 = vpop.eup %965  ;;  %v582_v7 = vsel %vm548_vm1, %v577_v63, 0.0 }
 0x424   : > { %v968_v8 = vpop.eup %967  ;;  %v583_v9 = vadd.f32 %v582_v7, %v581_v3  ;;  %v574_v14 = vmul.f32 %v966_v6, %v554_v56  ;;  %v632_v3 = vsub.s32 %v629_v60, %v1183_v43 }
 0x425   : > { %v566_v10 = vadd.f32 %v968_v8, %v966_v6  ;;  %v575_v15 = vmul.f32 %v968_v8, %v555_v57  ;;  %v646_v57 = vld [vmem:[%s1103_s14] sm:$0x1] }
 0x426   : > { %584 = vadd.xlane.f32.xlu0 %v583_v9  ;;  %v647_v58 = vadd.f32 1.0, %v646_v57  ;;  %v625_v9 = vld [vmem:[%s1092_s11] sm:$0x1] }
 0x427   : > { %567 = vadd.xlane.f32.xlu1 %v566_v10  ;;  %v578_v16 = vadd.f32 %v575_v15, %v574_v14 }
 0x428   : > { %648 = vst.msk [vmem:[%s1103_s14] sm:$0x1] %vm227_vm0, %v647_v58 }
 0x42b   : > { %572 = vadd.xlane.f32.xlu1 %v571_v13 }
 0x42f   : > { %579 = vadd.xlane.f32.xlu1 %v578_v16 }
 0x4b3   : > { %v585_v39 = vpop.xlane.xlu0 %584 }
 0x4b4   : > { %v568_v23 = vpop.xlane.xlu1 %567 }
 0x4b5   : > { %969 = vlog2.f32 %v568_v23 }
 0x4b6   : > { %971 = vrcp.f32 %v568_v23 }
 0x4b7   : > { %973 = vlog2.f32 %v530_v25 }
 0x4b8   : > { %v573_v26 = vpop.xlane.xlu1 %572 }
 0x4b9   : > { %975 = vlog2.f32 %v573_v26 }
 0x4ba   : > { %977 = vrcp.f32 %v573_v26 }
 0x4bc   : > { %v580_v32 = vpop.xlane.xlu1 %579 }
 0x4bf   : > { %v970_v29 = vpop.eup %969 }
 0x4c0   : > { %v972_v30 = vpop.eup %971  ;;  %v587_v31 = vmul.f32 0.6931472, %v970_v29 }
 0x4c1   : > { %v591_v34 = vmul.f32 %v972_v30, %v580_v32  ;;  %v974_v35 = vpop.eup %973 }
 0x4c2   : > { %v621_v42 = vmul.f32 0.6931472, %v974_v35 }
 0x4c3   : > { %v976_v36 = vpop.eup %975  ;;  %v594_v37 = vsub.f32 %v587_v31, %v591_v34 }
 0x4c4   : > { %v978_v38 = vpop.eup %977  ;;  %v589_v40 = vmul.f32 0.6931472, %v976_v36  ;;  %v622_v47 = vmul.f32 %v621_v42, %v608_v41 }
 0x4c5   : > { %v593_v44 = vmul.f32 %v978_v38, %v585_v39  ;;  %v609_v46 = vmul.f32 %v596_v17, %v594_v37 }
 0x4c6   : > { %979 = vrcp.f32 %v622_v47 }
 0x4c7   : > { %v595_v45 = vsub.f32 %v589_v40, %v593_v44  ;;  %v611_v49 = vsel %vm598_vm5, %v609_v46, 0.0 }
 0x4c9   : > { %v610_v48 = vmul.f32 %v597_v18, %v595_v45 }
 0x4cb   : > { %v612_v50 = vsel %vm600_vm6, %v610_v48, 0.0 }
 0x4cc   : > { %v613_v51 = vadd.f32 %v612_v50, %v611_v49 }
 0x4ce   : > { %v614_v52 = vrot.slane %v613_v51, 4 }
 0x4d0   : > { %v615_v53 = vadd.f32 %v614_v52, %v613_v51  ;;  %v980_v62 = vpop.eup %979 }
 0x4d2   : > { %v616_v56 = vrot.slane %v615_v53, 2 }
 0x4d4   : > { %v617_v59 = vadd.f32 %v616_v56, %v615_v53 }
 0x4d6   : > { %v618_v61 = vrot.slane %v617_v59, 1 }
 0x4d8   : > { %v619_v63 = vadd.f32 %v618_v61, %v617_v59 }
 0x4da   : > { %v624_v6 = vmul.f32 %v980_v62, %v619_v63 }
 0x4dc   : > { %v633_v7 = vrot.slane %v624_v6, %v632_v3 }
 0x4de   : > { %v640_v8 = vrot.slane %v633_v7, %v632_v3 }
 0x4e0   : > { %641 = vrot.lane.b32.xlu1 %v640_v8, %s1034_s8 }
 0x552   : > { %v642_v10 = vpop.permute.xlu1 %641 }
 0x553   : > { %v644_v11 = vadd.f32 %v642_v10, %v625_v9 }
 0x555   : > { %645 = vst.msk [vmem:[%s1092_s11] sm:$0x1] %vm227_vm0, %v644_v11 }
 0x556 PF: > { %s649_s9 = sadd.s32 3, %s1080_s24 }
 0x557   : > { %s650_s10 = sld [smem:[#allocation3 + %s649_s9]] }
 0x55d   : > { %p892_p12 = scmp.le.s32.totalorder %s650_s10, 0 }
 0x55e   : > { %vm655_vm7 = vcmp.eq.s32.totalorder (!%p892_p12), %v1094_v0, 3  ;;  %v659_v12 = vlaneseq (!%p892_p12)  ;;  %v1035_v13 = vmov (!%p892_p12), 0   ;;  %vm692_vm8 = vcmask (!%p892_p12), 1043456   ;;  %v740_v56 = vld [vmem:[%s1261_s3] sm:$0xff] (!%p892_p12)  ;;  %v741_v57 = vld [vmem:[%s1261_s3 + $0x8] sm:$0xf] (!%p892_p12) }
 0x55f   : > { %654 = sbr.rel (%p892_p12) target bundleno = 1854 (0x73e), region = 48  ;;  %v656_v14 = vsel (!%p892_p12), %vm655_vm7, 1, %v1035_v13  ;;  %v1036_v27 = vmov (!%p892_p12), 0.0   ;;  %vm669_vm11 = vcmask (!%p892_p12), 1040384   ;;  %vm742_vm12 = vcmask (!%p892_p12), 31768   ;;  %s1038_s16 = smov (!%p892_p12), 125  }
 0x560   : > { %v1220_v43 = vshrl.u32 (!%p892_p12), %v659_v12, 7  ;;  %v893_v28 = vsel (!%p892_p12), %vm655_vm7, 1.0, %v1036_v27  ;;  %vm744_vm13 = vcmask (!%p892_p12), 27672   ;;  %v743_v58 = vsel (!%p892_p12), %vm742_vm12, %v740_v56, 0.0 }
 0x561   : > { %v745_v59 = vsel (!%p892_p12), %vm744_vm13, %v741_v57, 0.0 }
 0x562   : > { %v661_v15 = vsub.s32 (!%p892_p12), 0, %v1220_v43  ;;  %v665_v16 = vsub.s32 (!%p892_p12), 1, %v1220_v43  ;;  %v746_v60 = vadd.f32 (!%p892_p12), %v745_v59, %v743_v58 }
 0x564   : > { %v678_v17 = vrot.slane (!%p892_p12), %v656_v14, %v661_v15  ;;  %v682_v18 = vrot.slane (!%p892_p12), %v656_v14, %v665_v16  ;;  %v662_v29 = vrot.slane (!%p892_p12), %v893_v28, %v661_v15  ;;  %v747_v61 = vrot.slane (!%p892_p12), %v746_v60, 4 }
 0x566   : > { %vm683_vm9 = vcmp.eq.s32.totalorder %v678_v17, 1  ;;  %vm684_vm10 = vcmp.eq.s32.totalorder %v682_v18, 1  ;;  %v748_v63 = vadd.f32 %v747_v61, %v746_v60 }
 0x567   : > { %v687_v19 = vsel %vm683_vm9, %v1107_v4, -1e+30  ;;  %v688_v20 = vsel %vm684_vm10, %v1109_v5, -1e+30  ;;  %v685_v23 = vsel %vm683_vm9, %v1096_v1, -1e+30  ;;  %v666_v4 = vrot.slane %v893_v28, %v665_v16 }
 0x568   : > { %v693_v21 = vsel %vm692_vm8, %v687_v19, -inf  ;;  %v694_v22 = vsel %vm692_vm8, %v688_v20, -inf  ;;  %v686_v24 = vsel %vm684_vm10, %v1098_v2, -1e+30  ;;  %v670_v5 = vsel %vm669_vm11, %v662_v29, 0.0 }
 0x569   : > { %v695_v25 = vmax.f32 %v693_v21, %v694_v22  ;;  %v689_v26 = vmax.f32 %v685_v23, %v686_v24  ;;  %v671_v30 = vsel %vm669_vm11, %v666_v4, 0.0  ;;  %v749_v7 = vrot.slane %v748_v63, 2 }
 0x56a   : > { %v672_v31 = vadd.f32 %v671_v30, %v670_v5 }
 0x56b   : > { %696 = vmax.xlane.f32.xlu0 %v695_v25  ;;  %v750_v8 = vadd.f32 %v749_v7, %v748_v63 }
 0x56d   : > { %v751_v13 = vrot.slane %v750_v8, 1 }
 0x56f   : > { %690 = vmax.xlane.f32.xlu0 %v689_v26  ;;  %v752_v21 = vadd.f32 %v751_v13, %v750_v8 }
 0x573   : > { %673 = vadd.xlane.f32.xlu0 %v672_v31  ;;  %v1037_v31 = vmov 1966171168  }
 0x5f8   : > { %v697_v32 = vpop.xlane.xlu0 %696 }
 0x5f9   : > { %v700_v33 = vsub.f32 %v687_v19, %v697_v32  ;;  %v701_v1 = vsub.f32 %v688_v20, %v697_v32  ;;  %v772_v32 = vunpack.c.l.s4 %v1037_v31 }
 0x5fb   : > { %v706_v34 = vmul.f32 1.442695, %v700_v33  ;;  %v708_v2 = vmul.f32 1.442695, %v701_v1 }
 0x5fc   : > { %v691_v35 = vpop.xlane.xlu0 %690 }
 0x5fd   : > { %981 = vpow2.f32 %v706_v34  ;;  %v698_v36 = vsub.f32 %v685_v23, %v691_v35  ;;  %v699_v37 = vsub.f32 %v686_v24, %v691_v35  ;;  %v773_v35 = vunpack.c.0.s8 %v772_v32 }
 0x5fe   : > { %983 = vpow2.f32 %v708_v2 }
 0x5ff   : > { %v702_v38 = vmul.f32 1.442695, %v698_v36  ;;  %v704_v0 = vmul.f32 1.442695, %v699_v37 }
 0x600   : > { %v674_v3 = vpop.xlane.xlu0 %673 }
 0x601   : > { %985 = vpow2.f32 %v702_v38 }
 0x602   : > { %987 = vpow2.f32 %v704_v0  ;;  %v776_v0 = vsub.s32 %v773_v35, %v1220_v43 }
 0x607   : > { %v982_v39 = vpop.eup %981 }
 0x608   : > { %v984_v40 = vpop.eup %983  ;;  %v720_v41 = vmul.f32 %v982_v39, %v700_v33  ;;  %v713_v50 = vsel %vm692_vm8, %v982_v39, 0.0 }
 0x609   : > { %v721_v42 = vmul.f32 %v984_v40, %v701_v1  ;;  %v714_v51 = vsel %vm692_vm8, %v984_v40, 0.0  ;;  %v790_v1 = vld [vmem:[%s1103_s14] sm:$0x1] }
 0x60a   : > { %v725_v44 = vsel %vm692_vm8, %v720_v41, 0.0  ;;  %v715_v52 = vadd.f32 %v714_v51, %v713_v50  ;;  %v791_v34 = vadd.f32 1.0, %v790_v1 }
 0x60b   : > { %v986_v45 = vpop.eup %985  ;;  %v726_v46 = vsel %vm692_vm8, %v721_v42, 0.0  ;;  %v769_v42 = vld [vmem:[%s1092_s11] sm:$0x1] }
 0x60c   : > { %v988_v47 = vpop.eup %987  ;;  %v727_v48 = vadd.f32 %v726_v46, %v725_v44  ;;  %v718_v53 = vmul.f32 %v986_v45, %v698_v36  ;;  %792 = vst.msk [vmem:[%s1103_s14] sm:$0x1] %vm227_vm0, %v791_v34 }
 0x60d   : > { %v710_v49 = vadd.f32 %v988_v47, %v986_v45  ;;  %v719_v54 = vmul.f32 %v988_v47, %v699_v37 }
 0x60e   : > { %728 = vadd.xlane.f32.xlu0 %v727_v48 }
 0x60f   : > { %711 = vadd.xlane.f32.xlu1 %v710_v49  ;;  %v722_v55 = vadd.f32 %v719_v54, %v718_v53 }
 0x613   : > { %716 = vadd.xlane.f32.xlu1 %v715_v52 }
 0x617   : > { %723 = vadd.xlane.f32.xlu1 %v722_v55 }
 0x69b   : > { %v729_v19 = vpop.xlane.xlu0 %728 }
 0x69c   : > { %v712_v62 = vpop.xlane.xlu1 %711 }
 0x69d   : > { %989 = vlog2.f32 %v712_v62 }
 0x69e   : > { %991 = vrcp.f32 %v712_v62 }
 0x69f   : > { %993 = vlog2.f32 %v674_v3 }
 0x6a0   : > { %v717_v6 = vpop.xlane.xlu1 %716 }
 0x6a1   : > { %995 = vlog2.f32 %v717_v6 }
 0x6a2   : > { %997 = vrcp.f32 %v717_v6 }
 0x6a4   : > { %v724_v12 = vpop.xlane.xlu1 %723 }
 0x6a7   : > { %v990_v9 = vpop.eup %989 }
 0x6a8   : > { %v992_v10 = vpop.eup %991  ;;  %v731_v11 = vmul.f32 0.6931472, %v990_v9 }
 0x6a9   : > { %v735_v14 = vmul.f32 %v992_v10, %v724_v12  ;;  %v994_v15 = vpop.eup %993 }
 0x6aa   : > { %v765_v22 = vmul.f32 0.6931472, %v994_v15 }
 0x6ab   : > { %v996_v16 = vpop.eup %995  ;;  %v738_v17 = vsub.f32 %v731_v11, %v735_v14 }
 0x6ac   : > { %v998_v18 = vpop.eup %997  ;;  %v733_v20 = vmul.f32 0.6931472, %v996_v16  ;;  %v766_v26 = vmul.f32 %v765_v22, %v752_v21 }
 0x6ad   : > { %v737_v23 = vmul.f32 %v998_v18, %v729_v19  ;;  %v753_v25 = vmul.f32 %v740_v56, %v738_v17 }
 0x6ae   : > { %999 = vrcp.f32 %v766_v26 }
 0x6af   : > { %v739_v24 = vsub.f32 %v733_v20, %v737_v23  ;;  %v755_v28 = vsel %vm742_vm12, %v753_v25, 0.0 }
 0x6b1   : > { %v754_v27 = vmul.f32 %v741_v57, %v739_v24 }
 0x6b3   : > { %v756_v29 = vsel %vm744_vm13, %v754_v27, 0.0 }
 0x6b4   : > { %v757_v4 = vadd.f32 %v756_v29, %v755_v28 }
 0x6b6   : > { %v758_v5 = vrot.slane %v757_v4, 4 }
 0x6b8   : > { %v759_v30 = vadd.f32 %v758_v5, %v757_v4  ;;  %v1000_v37 = vpop.eup %999 }
 0x6ba   : > { %v760_v33 = vrot.slane %v759_v30, 2 }
 0x6bc   : > { %v761_v2 = vadd.f32 %v760_v33, %v759_v30 }
 0x6be   : > { %v762_v36 = vrot.slane %v761_v2, 1 }
 0x6c0   : > { %v763_v38 = vadd.f32 %v762_v36, %v761_v2 }
 0x6c2   : > { %v768_v39 = vmul.f32 %v1000_v37, %v763_v38 }
 0x6c4   : > { %v777_v40 = vrot.slane %v768_v39, %v776_v0 }
 0x6c6   : > { %v784_v41 = vrot.slane %v777_v40, %v776_v0 }
 0x6c8   : > { %785 = vrot.lane.b32.xlu1 %v784_v41, %s1038_s16 }
 0x73a   : > { %v786_v44 = vpop.permute.xlu1 %785 }
 0x73b   : > { %v788_v45 = vadd.f32 %v786_v44, %v769_v42 }
 0x73d   : > { %789 = vst.msk [vmem:[%s1092_s11] sm:$0x1] %vm227_vm0, %v788_v45 }
 0x73e PF: > { %s22_s23 = sadd.s32 1, %s1021_s23  }
 0x73f   : > { %p19_p13 = scmp.ge.s32.totalorder %s22_s23, 4  }
 0x741   :  { %21 = sbr.rel (!%p19_p13) target bundleno = 16 (0x10), region = 93 }

</bundles_post_ra>
